<compile_context>
chip_gen: v5e
topology: v5e:2x2
jax: 0.10.0
libtpu: 0.0.40
codegen_flags: <defaults>
</compile_context>

<pallas_src>
import functools

import jax
import jax.numpy as jnp
from jax.experimental import pallas as pl
from jax.experimental.pallas import tpu as pltpu


_LANE_TILE = 512          # batch-lane tile for the large-B (gridded) path
_TILED_PATH_MIN_B = 256   # below this, a single un-gridded call is cheapest


def _round_up(n, m):
    return ((n + m - 1) // m) * m


def _maze2d_avoid_kernel(params_ref, pos_ref, o_ref, *, inv_t):
    """-mean_t(dist * (dist <= radius)) for each batch column.

    params_ref: (3,) f32 SMEM = [target_x, target_y, radius]
    pos_ref:    (2, T, Bn) VMEM; pos_ref[0] = x positions, pos_ref[1] = y.
    o_ref:      (1, Bn) VMEM; o_ref[0, b] = forward(x)[b].
    """
    tx = params_ref[0]
    ty = params_ref[1]
    r = params_ref[2]
    r2 = r * r

    px = pos_ref[0].astype(jnp.float32)          # (T, Bn)
    py = pos_ref[1].astype(jnp.float32)          # (T, Bn)

    dx = px - tx
    dy = py - ty
    d2 = dx * dx + dy * dy
    # Mask on squared distance: compare/select does not wait on the EUP sqrt.
    keep = d2 <= r2
    dist = jnp.sqrt(d2)
    eff = jnp.where(keep, dist, 0.0)

    # mean over trace length; negation folded into the store.
    mean = jnp.sum(eff, axis=0, keepdims=True) * inv_t   # (1, Bn)
    o_ref[...] = (-mean).astype(o_ref.dtype)


def _forward_impl(x, params):
    """x: (B, T, D>=4); params: (3,) f32 = [tx, ty, radius]. Returns (B,)."""
    B, T, D = x.shape
    assert D >= 4, "last dim must contain [x, y, vx, vy, ...]"

    # Only ship the two position lanes; batch -> lanes, T -> sublanes.
    pos = jnp.transpose(x[:, :, 2:4], (2, 1, 0))          # (2, T, B)

    kernel = functools.partial(_maze2d_avoid_kernel, inv_t=1.0 / T)
    itemsize = jnp.dtype(x.dtype).itemsize
    cost = pl.CostEstimate(
        flops=7 * T * B,
        transcendentals=T * B,
        bytes_accessed=2 * T * B * itemsize + B * itemsize + 12,
    )

    if B < _TILED_PATH_MIN_B:
        # Small/medium batch: one un-gridded call, whole unpadded slab as a
        # single block (block == full array waives the (8,128) rule).
        out = pl.pallas_call(
            kernel,
            out_shape=jax.ShapeDtypeStruct((1, B), x.dtype),
            in_specs=[
                pl.BlockSpec(memory_space=pltpu.MemorySpace.SMEM),    # params
                pl.BlockSpec((2, T, B), lambda: (0, 0, 0)),           # pos
            ],
            out_specs=pl.BlockSpec((1, B), lambda: (0, 0)),
            cost_estimate=cost,
        )(params, pos)
        return out[0]

    # Large batch: tile the lane (batch) axis with a parallel grid so both
    # v7x TensorCores participate and per-block VMEM stays bounded.  Padded
    # lane columns compute independent garbage and are sliced off.
    bn = _LANE_TILE
    b_pad = _round_up(B, bn)
    pos = jnp.pad(pos, ((0, 0), (0, 0), (0, b_pad - B)))
    out = pl.pallas_call(
        kernel,
        out_shape=jax.ShapeDtypeStruct((1, b_pad), x.dtype),
        grid=(b_pad // bn,),
        in_specs=[
            pl.BlockSpec(memory_space=pltpu.MemorySpace.SMEM),        # params
            pl.BlockSpec((2, T, bn), lambda i: (0, 0, i)),            # pos
        ],
        out_specs=pl.BlockSpec((1, bn), lambda i: (0, i)),
        compiler_params=pltpu.CompilerParams(
            dimension_semantics=("parallel",)),
        cost_estimate=cost,
    )(params, pos)
    return out[0, :B]


_forward_jit = jax.jit(_forward_impl)


def maze2d_avoid_guide_forward(x, target=(0.0457, 0.0458), radius=1.0):
    """Pallas forward of Maze2dAvoidGuide. Returns (B,) array = -value."""
    params = jnp.array(
        [float(target[0]), float(target[1]), float(radius)], dtype=jnp.float32)
    return _forward_jit(x, params)


def _reference(x, target, radius):
    pos_x = x[:, :, 2]
    pos_y = x[:, :, 3]
    dist = jnp.sqrt((pos_x - target[0]) ** 2 + (pos_y - target[1]) ** 2)
    mask = (dist <= radius).astype(jnp.float32)
    return -(dist * mask).mean(axis=1)


if __name__ == "__main__":
    key = jax.random.PRNGKey(0)
    target = (0.0457, 0.0458)
    radius = 1.0

    # Case 1: canonical small shape (batch=2, trace_length=8, dim=6).
    x1 = jax.random.normal(key, (2, 8, 6), dtype=jnp.float32)
    y1 = jax.block_until_ready(maze2d_avoid_guide_forward(x1, target, radius))
    r1 = _reference(x1, target, radius)
    assert y1.shape == (2,), y1.shape
    assert jnp.allclose(y1, r1, atol=1e-6, rtol=1e-5), (y1, r1)

    # Case 2: unaligned T and B (no padding needed: block == full array).
    x2 = jax.random.normal(jax.random.PRNGKey(1), (3, 11, 6), dtype=jnp.float32)
    y2 = jax.block_until_ready(maze2d_avoid_guide_forward(x2, target, radius))
    r2 = _reference(x2, target, radius)
    assert y2.shape == (3,), y2.shape
    assert jnp.allclose(y2, r2, atol=1e-6, rtol=1e-5), (y2, r2)

    # Case 3: exercise the lane-tiled (large-B) path.
    x3 = jax.random.normal(jax.random.PRNGKey(2), (260, 16, 6), dtype=jnp.float32)
    y3 = jax.block_until_ready(maze2d_avoid_guide_forward(x3, target, radius))
    r3 = _reference(x3, target, radius)
    assert y3.shape == (260,), y3.shape
    assert jnp.allclose(y3, r3, atol=1e-6, rtol=1e-5)

    print("KERNEL_OK")
</pallas_src>

<mosaic_0001>
module attributes {stable_mosaic.version = 11 : i64} {
  func.func @_maze2d_avoid_kernel(%arg0: memref<3xf32, #tpu.memory_space<smem>>, %arg1: memref<2x8x2xf32, #tpu.memory_space<vmem>>, %arg2: memref<1x2xf32, #tpu.memory_space<vmem>>) attributes {dimension_semantics = [], scalar_prefetch = 0 : i64, scratch_operands = 0 : i64, tpu.core_type = #tpu.core_type<tc>} {
    %c0 = arith.constant 0 : index
    %0 = memref.load %arg0[%c0] : memref<3xf32, #tpu.memory_space<smem>>
    %c1 = arith.constant 1 : index
    %1 = memref.load %arg0[%c1] : memref<3xf32, #tpu.memory_space<smem>>
    %c2 = arith.constant 2 : index
    %2 = memref.load %arg0[%c2] : memref<3xf32, #tpu.memory_space<smem>>
    %3 = arith.mulf %2, %2 : f32
    %c0_0 = arith.constant 0 : index
    %c0_1 = arith.constant 0 : index
    %c0_2 = arith.constant 0 : index
    %4 = vector.load %arg1[%c0_0, %c0_1, %c0_2] : memref<2x8x2xf32, #tpu.memory_space<vmem>>, vector<1x8x2xf32>
    %5 = vector.shape_cast %4 : vector<1x8x2xf32> to vector<8x2xf32>
    %c1_3 = arith.constant 1 : index
    %c0_4 = arith.constant 0 : index
    %c0_5 = arith.constant 0 : index
    %6 = vector.load %arg1[%c1_3, %c0_4, %c0_5] : memref<2x8x2xf32, #tpu.memory_space<vmem>>, vector<1x8x2xf32>
    %7 = vector.shape_cast %6 : vector<1x8x2xf32> to vector<8x2xf32>
    %8 = vector.broadcast %0 : f32 to vector<8x2xf32>
    %9 = arith.subf %5, %8 : vector<8x2xf32>
    %10 = vector.broadcast %1 : f32 to vector<8x2xf32>
    %11 = arith.subf %7, %10 : vector<8x2xf32>
    %12 = arith.mulf %9, %9 : vector<8x2xf32>
    %13 = arith.mulf %11, %11 : vector<8x2xf32>
    %14 = arith.addf %12, %13 : vector<8x2xf32>
    %15 = vector.broadcast %3 : f32 to vector<8x2xf32>
    %16 = arith.cmpf ole, %14, %15 : vector<8x2xf32>
    %17 = math.sqrt %14 : vector<8x2xf32>
    %cst = arith.constant 0.000000e+00 : f32
    %18 = vector.broadcast %cst : f32 to vector<8x2xf32>
    %19 = arith.select %16, %17, %18 : vector<8x2xi1>, vector<8x2xf32>
    %cst_6 = arith.constant dense<0.000000e+00> : vector<2xf32>
    %20 = vector.multi_reduction <add>, %19, %cst_6 [0] : vector<8x2xf32> to vector<2xf32>
    %21 = vector.shape_cast %20 : vector<2xf32> to vector<1x2xf32>
    %cst_7 = arith.constant 1.250000e-01 : f32
    %22 = vector.broadcast %cst_7 : f32 to vector<1x2xf32>
    %23 = arith.mulf %21, %22 : vector<1x2xf32>
    %cst_8 = arith.constant 0.000000e+00 : f32
    %24 = vector.broadcast %cst_8 : f32 to vector<1x2xf32>
    %25 = arith.subf %24, %23 : vector<1x2xf32>
    %c0_9 = arith.constant 0 : index
    %c0_10 = arith.constant 0 : index
    %26 = vector.load %arg2[%c0_9, %c0_10] : memref<1x2xf32, #tpu.memory_space<vmem>>, vector<1x2xf32>
    tpu.vector_store %arg2[%c0_9, %c0_10], %25 {strides = array<i32>} : memref<1x2xf32, #tpu.memory_space<vmem>>, vector<1x2xf32>,
    return
  }
}

</mosaic_0001>

<bundles_post_ra>
// kernel: _forward_impl.1
= control target key start
LH: loop header
LB: loop body
LE: loop exit
PB: predicated region body
PF: predicated region fallthrough
CT: control target
= control target key end

     0   :  { %7 = vsyncpa [#allocation4], 0  ;;  %s159_s0 = inlined_call_operand.vmem [shape: f32[3], index: 0, kind: input, shape index: {}]   ;;  %s160_s1 = inlined_call_operand.vmem [shape: f32[2,8,2], index: 1, kind: input, shape index: {}]   ;;  %s161_s2 = inlined_call_operand.hbm [shape: f32[1,2], index: 2, kind: output, shape index: {}]  }
   0x1   :  { %8 = vsyncpa [#allocation3], 0  ;;  %s14_s11 = sshll.u32 %s159_s0, 4  ;;  %s130_s12 = smov [#allocation2]   ;;  %s15_s11 = int_to_ptr.vmem [resolvable:$true] %s14_s11 }
   0x2   :  { %17 = dma.vmem_to_smem %s15_s11, 16, %s130_s12, [#allocation4]  }
   0x3   :  { %126 = dma.done.wait [#allocation4], 16  }
   0x4   :  { %127 = vsyncadd [#allocation4], 4294967280 }
   0x5   :  { %24 = sfence }
   0x6   :  { %s25_s13 = sld [smem:[#allocation2]]  ;;  %v29_v0 = vld [vmem:[%s160_s1] sm:$0xff]  ;;  %v85_v1 = vld [vmem:[%s160_s1 + $0x8] sm:$0xff]  ;;  %vm54_vm3 = vcmask 15360   ;;  %s131_s1 = smov [#allocation5]   ;;  %vm64_vm4 = vcmask 8192  }
   0x7   :  { %s83_s14 = sld [smem:[#allocation2 + $0x1]]  ;;  %s71_s20 = sshll.u32 %s131_s1, 4  ;;  %s72_s20 = int_to_ptr.vmem [resolvable:$true] %s71_s20 }
   0x8   :  { %s84_s0 = sld [smem:[#allocation2 + $0x2]]  ;;  %s73_s23 = sshll.u32 %s161_s2, 4  ;;  %s74_s23 = int_to_ptr.hbm [resolvable:$true] %s73_s23 }
   0xc   :  { %v32_v2 = vstv %s25_s13 }
   0xd   :  { %v33_v3 = vsub.f32 %v29_v0, %v32_v2  ;;  %v34_v4 = vstv %s83_s14 }
   0xe   :  { %v35_v5 = vsub.f32 %v85_v1, %v34_v4  ;;  %s28_s19 = smul.f32 %s84_s0, %s84_s0 }
   0xf   :  { %v36_v6 = vmul.f32 %v33_v3, %v33_v3 }
  0x10   :  { %v37_v7 = vmul.f32 %v35_v5, %v35_v5  ;;  %v39_v14 = vstv %s28_s19 }
  0x12   :  { %v38_v8 = vadd.f32 %v37_v7, %v36_v6 }
  0x14   :  { %88 = vrsqrt.f32 %v38_v8  ;;  %vm48_vm0 = vcmp.eq.f32.partialorder %v38_v8, inf  ;;  %v51_v16 = vand.u32 2147483648, %v38_v8  ;;  %vm50_vm1 = vcmp.eq.f32.partialorder %v38_v8, 0.0 }
  0x15   :  { %vm40_vm2 = vcmp.le.f32.partialorder %v38_v8, %v39_v14 }
  0x1a   :  { %v89_v9 = vpop.eup %88 }
  0x1b   :  { %v42_v10 = vmul.f32 %v89_v9, %v38_v8 }
  0x1d   :  { %v43_v11 = vmul.f32 %v89_v9, %v42_v10 }
  0x1f   :  { %v44_v12 = vmul.f32 0.5, %v43_v11 }
  0x21   :  { %v45_v13 = vsub.f32 1.5, %v44_v12 }
  0x23   :  { %v46_v15 = vmul.f32 %v89_v9, %v45_v13 }
  0x25   :  { %v47_v17 = vmul.f32 %v46_v15, %v38_v8 }
  0x27   :  { %v49_v18 = vsel %vm48_vm0, %v38_v8, %v47_v17 }
  0x28   :  { %v52_v19 = vsel %vm50_vm1, %v51_v16, %v49_v18 }
  0x29   :  { %v53_v20 = vsel %vm40_vm2, %v52_v19, 0.0 }
  0x2a   :  { %v55_v21 = vsel %vm54_vm3, %v53_v20, 0.0 }
  0x2b   :  { %v56_v22 = vrot.slane %v55_v21, 4 }
  0x2d   :  { %v57_v23 = vadd.f32 %v56_v22, %v55_v21 }
  0x2f   :  { %v58_v24 = vrot.slane %v57_v23, 2 }
  0x31   :  { %v59_v25 = vadd.f32 %v58_v24, %v57_v23 }
  0x33   :  { %v60_v26 = vrot.slane %v59_v25, 1 }
  0x35   :  { %v61_v27 = vadd.f32 %v60_v26, %v59_v25 }
  0x37   :  { %v62_v28 = vmul.f32 0.125, %v61_v27 }
  0x39   :  { %v63_v29 = vsub.f32 0.0, %v62_v28 }
  0x3b   :  { %65 = vst.msk [vmem:[#allocation5] sm:$0x1] %vm64_vm4, %v63_v29 }
  0x3c   :  { %76 = dma.vmem_to_hbm [thread:$0]  %s72_s20, 16, %s74_s23, [#allocation3]  }
  0x3d   :  { %128 = dma.done.wait [#allocation3], 16  }
  0x3e   :  { %129 = vsyncadd [#allocation3], 4294967280 }
  0x3f   :  { %81 = vsyncpa [#allocation3], 1 }
  0x40   :  { %82 = vsyncpa [#allocation4], 1 }

</bundles_post_ra>
